<compile_context>
chip_gen: v6e
topology: v6e:2x2x1
jax: 0.10.0
libtpu: 0.0.40
codegen_flags: <defaults>
</compile_context>

<pallas_src>
import jax
import jax.numpy as jnp
from jax.experimental import pallas as pl
from jax.experimental.pallas import tpu as pltpu


# ----------------------------- kernels --------------------------------------

def _matmul_ws_kernel(x_ref, wt_ref, o_ref):
    # Weight-stationary: the full (Kp, Np) weight block is resident in VMEM
    # (constant block index), K is not split -> write the tile result directly.
    o_ref[...] = jnp.dot(
        x_ref[...], wt_ref[...], preferred_element_type=jnp.float32
    ).astype(o_ref.dtype)


def _matmul_kernel_f32out(x_ref, wt_ref, o_ref):
    # f32 output: accumulate straight into the resident output block
    # (same block index for every k), no scratch / final copy needed.
    @pl.when(pl.program_id(2) == 0)
    def _():
        o_ref[...] = jnp.zeros_like(o_ref)

    o_ref[...] += jnp.dot(
        x_ref[...], wt_ref[...], preferred_element_type=jnp.float32
    )


def _matmul_kernel_scratch(x_ref, wt_ref, o_ref, acc_ref):
    # Non-f32 output: accumulate in an f32 VMEM scratch, cast once at the end.
    k = pl.program_id(2)

    @pl.when(k == 0)
    def _():
        acc_ref[...] = jnp.zeros_like(acc_ref)

    acc_ref[...] += jnp.dot(
        x_ref[...], wt_ref[...], preferred_element_type=jnp.float32
    )

    @pl.when(k == pl.num_programs(2) - 1)
    def _():
        o_ref[...] = acc_ref[...].astype(o_ref.dtype)


# ----------------------------- helpers --------------------------------------

def _round_up(v, m):
    return ((v + m - 1) // m) * m


def _default_tiles():
    """Generation-specific (tm, tn, tk) tile targets for the general path."""
    kind = ""
    try:
        kind = jax.devices()[0].device_kind.lower()
    except Exception:  # AOT / mock compile: perf-only, not numerics.
        pass
    if ("v5 lite" in kind) or ("v5e" in kind) or ("v5litepod" in kind):
        # v5e: ~820 GB/s HBM is the binding resource -> wide tiles, lane-dense.
        return 512, 512, 512
    if "v6" in kind:
        # v6e: 128 MiB VMEM, ~1.4 TB/s HBM -> go big to cross the MXU roofline.
        return 512, 1024, 1024
    if ("7x" in kind) or ("v7" in kind):
        # v7x: only 64 MiB VMEM but 3.2 TB/s HBM -> slightly smaller K tile.
        return 512, 1024, 512
    return 512, 512, 512


def _pick_tile(dim, target, granule):
    """Tile size for a dim already rounded to `granule`.

    Prefers divisors of `dim` (no padding, no wasted MACs); only falls back to
    `target` (caller then pads) when no reasonable divisor exists.
    """
    target = max(granule, (target // granule) * granule)
    if dim <= target:
        return dim
    best = granule
    for cand in range(granule, target + 1, granule):
        if dim % cand == 0:
            best = cand
    if best * 2 >= target:
        return best
    # Allow a slightly larger divisor (up to 2x target) before resorting to pad.
    for cand in range(target + granule, min(dim, 2 * target) + 1, granule):
        if dim % cand == 0:
            return cand
    return target


# ----------------------------- wrapper ---------------------------------------

def linear_transform(
    x,
    w_t,
    *,
    tiles=None,
    compute_dtype=None,
    out_dtype=None,
    max_weight_vmem_bytes=12 * 1024 * 1024,
    force_pallas=False,
):
    """y = x @ w_t   (w_t is the transposed nn.Linear weight, shape (K, N))."""
    M, K = x.shape
    K2, N = w_t.shape
    assert K == K2, (K, K2)
    out_dtype = out_dtype if out_dtype is not None else x.dtype

    if compute_dtype is not None:
        x = x.astype(compute_dtype)
        w_t = w_t.astype(compute_dtype)
    in_dtype = x.dtype
    in_itemsize = jnp.dtype(in_dtype).itemsize
    out_itemsize = jnp.dtype(out_dtype).itemsize

    # Tiny problems: a Pallas launch is pure overhead; let XLA fuse a dot.
    if not force_pallas and (M * N * K) < (128 * 128 * 128):
        return jnp.dot(
            x, w_t, preferred_element_type=jnp.float32
        ).astype(out_dtype)

    tm_t, tn_t, tk_t = tiles if tiles is not None else _default_tiles()

    # (8,128)-rounded problem dims.
    M8 = _round_up(M, 8)
    K128 = _round_up(K, 128)
    N128 = _round_up(N, 128)

    tm = _pick_tile(M8, tm_t, 8)

    # ---- weight-stationary fast path ----------------------------------------
    w_bytes = K128 * N128 * in_itemsize
    ws_footprint = (
        2 * tm * K128 * in_itemsize        # double-buffered x blocks
        + 2 * K128 * N128 * in_itemsize    # resident weight (budget 2x, safe)
        + 2 * tm * N128 * out_itemsize     # double-buffered out blocks
    )
    use_ws = (
        w_bytes <= max_weight_vmem_bytes
        and ws_footprint <= 40 * 1024 * 1024   # fits v7x's 64 MiB with headroom
    )

    if use_ws:
        Kp, Np = K128, N128
        tn, tk = Np, Kp
    else:
        tn = _pick_tile(N128, tn_t, 128)
        tk = _pick_tile(K128, tk_t, 128)
        Kp, Np = _round_up(K128, tk), _round_up(N128, tn)
    Mp = _round_up(M8, tm)

    # Pad only when a dim is ragged (K padding is required for correctness of
    # the reduction; M/N padding rows/cols are sliced off and contribute 0).
    xp = x if (Mp == M and Kp == K) else jnp.pad(x, ((0, Mp - M), (0, Kp - K)))
    wp = (
        w_t
        if (Kp == K and Np == N)
        else jnp.pad(w_t, ((0, Kp - K), (0, Np - N)))
    )

    if use_ws:
        grid_m = Mp // tm
        cost = pl.CostEstimate(
            flops=2 * Mp * Np * Kp,
            transcendentals=0,
            bytes_accessed=int(
                Mp * Kp * in_itemsize      # x streamed once
                + Kp * Np * in_itemsize    # weight read once
                + Mp * Np * out_itemsize   # output written once
            ),
        )
        vmem_limit = int(min(max(ws_footprint + (8 << 20), 16 << 20), 56 << 20))
        out = pl.pallas_call(
            _matmul_ws_kernel,
            out_shape=jax.ShapeDtypeStruct((Mp, Np), out_dtype),
            grid_spec=pltpu.PrefetchScalarGridSpec(
                num_scalar_prefetch=0,
                grid=(grid_m,),
                in_specs=[
                    pl.BlockSpec((tm, Kp), lambda i: (i, 0)),
                    pl.BlockSpec((Kp, Np), lambda i: (0, 0)),  # stationary
                ],
                out_specs=pl.BlockSpec((tm, Np), lambda i: (i, 0)),
            ),
            compiler_params=pltpu.CompilerParams(
                dimension_semantics=("parallel",),
                vmem_limit_bytes=vmem_limit,
            ),
            cost_estimate=cost,
        )(xp, wp)
    else:
        grid_m, grid_n, grid_k = Mp // tm, Np // tn, Kp // tk

        if jnp.dtype(out_dtype) == jnp.dtype(jnp.float32):
            kernel = _matmul_kernel_f32out
            scratch = []
            acc_bytes = 0
        else:
            kernel = _matmul_kernel_scratch
            scratch = [pltpu.VMEM((tm, tn), jnp.float32)]
            acc_bytes = tm * tn * 4

        footprint = (
            2 * (tm * tk + tk * tn) * in_itemsize
            + 2 * tm * tn * out_itemsize
            + acc_bytes
        )
        vmem_limit = int(min(max(footprint + (8 << 20), 16 << 20), 56 << 20))

        cost = pl.CostEstimate(
            flops=2 * Mp * Np * Kp,
            transcendentals=0,
            bytes_accessed=int(
                Mp * Kp * in_itemsize * grid_n    # x re-read per N tile
                + Kp * Np * in_itemsize * grid_m  # w re-read per M tile
                + Mp * Np * out_itemsize          # output written once
            ),
        )

        out = pl.pallas_call(
            kernel,
            out_shape=jax.ShapeDtypeStruct((Mp, Np), out_dtype),
            grid_spec=pltpu.PrefetchScalarGridSpec(
                num_scalar_prefetch=0,
                grid=(grid_m, grid_n, grid_k),
                in_specs=[
                    pl.BlockSpec((tm, tk), lambda i, j, k: (i, k)),
                    pl.BlockSpec((tk, tn), lambda i, j, k: (k, j)),
                ],
                out_specs=pl.BlockSpec((tm, tn), lambda i, j, k: (i, j)),
                scratch_shapes=scratch,
            ),
            compiler_params=pltpu.CompilerParams(
                dimension_semantics=("parallel", "parallel", "arbitrary"),
                vmem_limit_bytes=vmem_limit,
            ),
            cost_estimate=cost,
        )(xp, wp)

    if Mp != M or Np != N:
        out = out[:M, :N]
    return out


if __name__ == "__main__":
    key = jax.random.PRNGKey(0)
    k1, k2, k3, k4, k5, k6, k7, k8 = jax.random.split(key, 8)

    # --- Case 1: tiny module shapes (forced through Pallas; weight-stationary) ---
    batch, input_dim, output_dim = 8, 32, 16
    x1 = jax.random.normal(k1, (batch, input_dim), dtype=jnp.float32)
    # PyTorch nn.Linear weight shape is (output_dim, input_dim); y = x @ W.T.
    w1 = jax.random.normal(k2, (output_dim, input_dim), dtype=jnp.float32) * 0.02
    y1 = linear_transform(x1, w1.T, force_pallas=True)
    jax.block_until_ready(y1)
    y1_ref = jnp.dot(x1, w1.T, precision=jax.lax.Precision.HIGHEST)
    assert y1.shape == (batch, output_dim)
    assert jnp.allclose(y1, y1_ref, atol=1e-4, rtol=1e-4), "case 1 mismatch"

    # --- Case 2: typical nn.Linear shapes, weight-stationary path, no padding ---
    M2, K2d, N2 = 384, 512, 640
    x2 = jax.random.normal(k3, (M2, K2d), dtype=jnp.float32)
    w2 = jax.random.normal(k4, (N2, K2d), dtype=jnp.float32) * 0.02
    y2 = linear_transform(x2, w2.T)
    jax.block_until_ready(y2)
    y2_ref = jnp.dot(x2, w2.T, precision=jax.lax.Precision.HIGHEST)
    assert y2.shape == (M2, N2)
    assert jnp.allclose(y2, y2_ref, atol=1e-3, rtol=1e-3), "case 2 mismatch"

    # --- Case 3: force the general 3-D tiled path (f32 accumulate-into-output) ---
    M3, K3d, N3 = 256, 384, 256
    x3 = jax.random.normal(k5, (M3, K3d), dtype=jnp.float32)
    w3 = jax.random.normal(k6, (N3, K3d), dtype=jnp.float32) * 0.02
    y3 = linear_transform(x3, w3.T, tiles=(128, 128, 128), max_weight_vmem_bytes=0)
    jax.block_until_ready(y3)
    y3_ref = jnp.dot(x3, w3.T, precision=jax.lax.Precision.HIGHEST)
    assert y3.shape == (M3, N3)
    assert jnp.allclose(y3, y3_ref, atol=1e-3, rtol=1e-3), "case 3 mismatch"

    # --- Case 4: bf16 inputs/outputs (f32 scratch accumulator path) ---
    M4, K4d, N4 = 64, 256, 256
    x4 = jax.random.normal(k7, (M4, K4d), dtype=jnp.float32)
    w4 = jax.random.normal(k8, (N4, K4d), dtype=jnp.float32) * 0.02
    y4 = linear_transform(
        x4, w4.T, compute_dtype=jnp.bfloat16, out_dtype=jnp.bfloat16,
        max_weight_vmem_bytes=0,
    )
    jax.block_until_ready(y4)
    y4_ref = jnp.dot(
        x4.astype(jnp.bfloat16).astype(jnp.float32),
        w4.T.astype(jnp.bfloat16).astype(jnp.float32),
        precision=jax.lax.Precision.HIGHEST,
    ).astype(jnp.bfloat16)
    assert y4.shape == (M4, N4)
    assert jnp.allclose(
        y4.astype(jnp.float32), y4_ref.astype(jnp.float32), atol=2e-2, rtol=2e-2
    ), "case 4 mismatch"

    print("KERNEL_OK")
</pallas_src>

<mosaic_0001>
module attributes {stable_mosaic.version = 11 : i64} {
  func.func @_matmul_ws_kernel(%arg0: i32, %arg1: memref<8x128xf32, #tpu.memory_space<vmem>>, %arg2: memref<128x128xf32, #tpu.memory_space<vmem>>, %arg3: memref<8x128xf32, #tpu.memory_space<vmem>>) attributes {dimension_semantics = [#tpu.dimension_semantics<parallel>], iteration_bounds = array<i64: 1>, scalar_prefetch = 0 : i64, scratch_operands = 0 : i64, tpu.core_type = #tpu.core_type<tc>, window_params = [{transform_indices = @transform_0, window_bounds = array<i64: 8, 128>}, {pipeline_mode = #tpu.pipeline_mode<synchronous>, transform_indices = @transform_1, window_bounds = array<i64: 128, 128>}, {transform_indices = @transform_2, window_bounds = array<i64: 8, 128>}]} {
    %c0 = arith.constant 0 : index
    %c0_0 = arith.constant 0 : index
    %0 = vector.load %arg1[%c0, %c0_0] : memref<8x128xf32, #tpu.memory_space<vmem>>, vector<8x128xf32>
    %c0_1 = arith.constant 0 : index
    %c0_2 = arith.constant 0 : index
    %1 = vector.load %arg2[%c0_1, %c0_2] : memref<128x128xf32, #tpu.memory_space<vmem>>, vector<128x128xf32>
    %cst = arith.constant dense<0.000000e+00> : vector<8x128xf32>
    %2 = tpu.matmul %0, %1, %cst {dimension_numbers = #tpu.dot_dimension_numbers<[1], [0], [0], [1], [0, 0, 1, 1], [], []>} : vector<8x128xf32>, vector<128x128xf32>, vector<8x128xf32> -> vector<8x128xf32>
    %c0_3 = arith.constant 0 : index
    %c0_4 = arith.constant 0 : index
    %3 = vector.load %arg3[%c0_3, %c0_4] : memref<8x128xf32, #tpu.memory_space<vmem>>, vector<8x128xf32>
    tpu.vector_store %arg3[%c0_3, %c0_4], %2 {strides = array<i32>} : memref<8x128xf32, #tpu.memory_space<vmem>>, vector<8x128xf32>,
    return
  }
  func.func @transform_0(%arg0: i32) -> (i32, i32) {
    %c0_i32 = arith.constant 0 : i32
    %c0_i32_0 = arith.constant 0 : i32
    return %arg0, %c0_i32 : i32, i32
  }
  func.func @transform_1(%arg0: i32) -> (i32, i32) {
    %c0_i32 = arith.constant 0 : i32
    %c0_i32_0 = arith.constant 0 : i32
    %c0_i32_1 = arith.constant 0 : i32
    return %c0_i32, %c0_i32_0 : i32, i32
  }
  func.func @transform_2(%arg0: i32) -> (i32, i32) {
    %c0_i32 = arith.constant 0 : i32
    %c0_i32_0 = arith.constant 0 : i32
    return %arg0, %c0_i32 : i32, i32
  }
}

</mosaic_0001>

<bundles_post_ra>
// kernel: tpu_custom_call.1
= control target key start
LH: loop header
LB: loop body
LE: loop exit
PB: predicated region body
PF: predicated region fallthrough
CT: control target
= control target key end

     0   :  { %7 = vsyncpa [#allocation3], 0  ;;  %s298_s0 = inlined_call_operand.hbm [shape: f32[8,128], index: 0, kind: input, shape index: {}]   ;;  %s299_s1 = inlined_call_operand.hbm [shape: f32[128,128], index: 1, kind: input, shape index: {}]   ;;  %s300_s2 = inlined_call_operand.hbm [shape: f32[8,128], index: 2, kind: output, shape index: {}]  }
   0x1   :  { %8 = vsyncpa [#allocation6], 0 }
   0x2   :  { %9 = vsyncpa [#allocation4], 0  ;;  %s267_s9 = smov [#allocation2]   ;;  %s268_s11 = smov [#allocation5]  }
   0x3   :  { %s16_s10 = sshll.u32 %s267_s9, 4  ;;  %s25_s12 = sshll.u32 %s268_s11, 4  ;;  %s17_s10 = int_to_ptr.vmem [resolvable:$true] %s16_s10  ;;  %s26_s12 = int_to_ptr.vmem [resolvable:$true] %s25_s12 }
   0x4   :  { %s209_s13 = scalar_lea.vmem %s17_s10, 128  ;;  %p214_p1 = scmp.lt.s32.totalorder %s17_s10, %s17_s10 }
   0x5   :  { %p210_p0 = scmp.ne.s32.totalorder %s17_s10, %s209_s13  ;;  %p215_p2 = scmp.lt.s32.totalorder %s209_s13, %s209_s13 }
   0x7   :  { %p216_p3 = por %p215_p2, %p214_p1 }
   0x9   :  { %p217_p4 = pnand %p216_p3, %p210_p0 }
   0xb   :  { %220 = shalt.err (!%p217_p4)
}
   0xc   :  { %19 = dma.hbm_to_vmem [thread:$0]  %s298_s0, 128, %s17_s10, [#allocation3]  }
   0xd   :  { %s229_s16 = scalar_lea.vmem %s26_s12, 2048  ;;  %p234_p6 = scmp.lt.s32.totalorder %s26_s12, %s26_s12 }
   0xe   :  { %p230_p5 = scmp.ne.s32.totalorder %s26_s12, %s229_s16  ;;  %p235_p7 = scmp.lt.s32.totalorder %s229_s16, %s229_s16 }
  0x10   :  { %p236_p8 = por %p235_p7, %p234_p6 }
  0x12   :  { %p237_p9 = pnand %p236_p8, %p230_p5 }
  0x14   :  { %240 = shalt.err (!%p237_p9)
}
  0x15   :  { %s269_s17 = smov 128   ;;  %s270_s18 = smov 8  }
  0x16   :  { %31 = dma.hbm_to_vmem [thread:$0]  %s299_s1, 2048, %s26_s12, [#allocation6], %s269_s17, %s269_s17, %s270_s18  }
  0x17   :  { %261 = dma.done.wait [#allocation3], 128  }
  0x18   :  { %262 = vsyncadd [#allocation3], 4294967168 }
  0x19   :  { %263 = dma.done.wait [#allocation6], 2048  }
  0x1a   :  { %264 = vsyncadd [#allocation6], 4294965248  ;;  %v271_v0 = vmov 0.0   ;;  %vm272_vm0 = vmmov 0   ;;  %v54_v1 = vld [vmem:[#allocation5 + $0x78] sm:$0xff]  ;;  %v53_v2 = vld [vmem:[#allocation5 + $0x70] sm:$0xff] }
  0x1b   :  { %159 = vmatprep.subr.mxu0 %v271_v0  ;;  %191 = vmatprep.mubr.msk.f32.mxu0 %vm272_vm0, %v271_v0  ;;  %v52_v3 = vld [vmem:[#allocation5 + $0x68] sm:$0xff]  ;;  %v51_v4 = vld [vmem:[#allocation5 + $0x60] sm:$0xff]  ;;  %v50_v5 = vld [vmem:[#allocation5 + $0x58] sm:$0xff]  ;;  %s273_s0 = smov [#allocation7]  }
  0x1c   :  { %160 = vmatpush3.msra.mxu0 %v54_v1  ;;  %v49_v6 = vld [vmem:[#allocation5 + $0x50] sm:$0xff]  ;;  %v48_v7 = vld [vmem:[#allocation5 + $0x48] sm:$0xff]  ;;  %v47_v8 = vld [vmem:[#allocation5 + $0x40] sm:$0xff]  ;;  %s132_s1 = sshll.u32 %s273_s0, 4  ;;  %s133_s1 = int_to_ptr.vmem [resolvable:$true] %s132_s1 }
  0x1d   :  { %161 = vmatprep.subr.mxu0 %v271_v0  ;;  %v46_v9 = vld [vmem:[#allocation5 + $0x38] sm:$0xff]  ;;  %v45_v10 = vld [vmem:[#allocation5 + $0x30] sm:$0xff]  ;;  %v44_v11 = vld [vmem:[#allocation5 + $0x28] sm:$0xff]  ;;  %s241_s21 = scalar_lea.vmem %s133_s1, 128  ;;  %p246_p11 = scmp.lt.s32.totalorder %s133_s1, %s133_s1 }
  0x1e   :  { %162 = vmatpush3.msra.mxu0 %v53_v2  ;;  %v43_v12 = vld [vmem:[#allocation5 + $0x20] sm:$0xff]  ;;  %v42_v13 = vld [vmem:[#allocation5 + $0x18] sm:$0xff]  ;;  %v41_v14 = vld [vmem:[#allocation5 + $0x10] sm:$0xff]  ;;  %p242_p10 = scmp.ne.s32.totalorder %s133_s1, %s241_s21  ;;  %p247_p12 = scmp.lt.s32.totalorder %s241_s21, %s241_s21 }
  0x1f   :  { %163 = vmatprep.subr.mxu0 %v271_v0  ;;  %v40_v15 = vld [vmem:[#allocation5 + $0x8] sm:$0xff]  ;;  %v39_v16 = vld [vmem:[#allocation5] sm:$0xff]  ;;  %v38_v17 = vld [vmem:[#allocation2] sm:$0xff] }
  0x20   :  { %164 = vmatpush3.msra.mxu0 %v52_v3  ;;  %p248_p13 = por %p247_p12, %p246_p11 }
  0x21   :  { %165 = vmatprep.subr.mxu0 %v271_v0 }
  0x22   :  { %166 = vmatpush3.msra.mxu0 %v51_v4  ;;  %p249_p0 = pnand %p248_p13, %p242_p10 }
  0x23   :  { %167 = vmatprep.subr.mxu0 %v271_v0 }
  0x24   :  { %168 = vmatpush3.msra.mxu0 %v50_v5 }
  0x25   :  { %169 = vmatprep.subr.mxu0 %v271_v0 }
  0x26   :  { %170 = vmatpush3.msra.mxu0 %v49_v6 }
  0x27   :  { %171 = vmatprep.subr.mxu0 %v271_v0 }
  0x28   :  { %172 = vmatpush3.msra.mxu0 %v48_v7 }
  0x29   :  { %173 = vmatprep.subr.mxu0 %v271_v0 }
  0x2a   :  { %174 = vmatpush3.msra.mxu0 %v47_v8 }
  0x2b   :  { %175 = vmatprep.subr.mxu0 %v271_v0 }
  0x2c   :  { %176 = vmatpush3.msra.mxu0 %v46_v9 }
  0x2d   :  { %177 = vmatprep.subr.mxu0 %v271_v0 }
  0x2e   :  { %178 = vmatpush3.msra.mxu0 %v45_v10 }
  0x2f   :  { %179 = vmatprep.subr.mxu0 %v271_v0 }
  0x30   :  { %180 = vmatpush3.msra.mxu0 %v44_v11 }
  0x31   :  { %181 = vmatprep.subr.mxu0 %v271_v0 }
  0x32   :  { %182 = vmatpush3.msra.mxu0 %v43_v12 }
  0x33   :  { %183 = vmatprep.subr.mxu0 %v271_v0 }
  0x34   :  { %184 = vmatpush3.msra.mxu0 %v42_v13 }
  0x35   :  { %185 = vmatprep.subr.mxu0 %v271_v0 }
  0x36   :  { %186 = vmatpush3.msra.mxu0 %v41_v14 }
  0x37   :  { %187 = vmatprep.subr.mxu0 %v271_v0 }
  0x38   :  { %188 = vmatpush3.msra.mxu0 %v40_v15 }
  0x39   :  { %189 = vmatprep.subr.mxu0 %v271_v0 }
  0x3a   :  { %190 = vmatpush3.msra.mxu0 %v39_v16 }
  0x3b   :  { %192 = vmatmul.mubr.f32.vlgmr.msra.gmra.mxu0 %v38_v17 }
  0xfb   :  { %v121_v18 = vpop.f32.mrf.mxu0 }
  0xfc   :  { %125 = vst [vmem:[#allocation7] sm:$0xff] %v121_v18 }
  0xfd   :  { %v193_v19 = vpop.f32.mrf.mxu0 }
  0xfe   :  { %252 = shalt.err (!%p249_p0)
}
  0xff   :  { %135 = dma.vmem_to_hbm [thread:$0]  %s133_s1, 128, %s300_s2, [#allocation4]  }
 0x100   :  { %265 = dma.done.wait [#allocation4], 128  }
 0x101   :  { %266 = vsyncadd [#allocation4], 4294967168 }
 0x102   :  { %139 = vsyncpa [#allocation3], 1 }
 0x103   :  { %140 = vsyncpa [#allocation6], 1 }
 0x104   :  { %141 = vsyncpa [#allocation4], 1 }

</bundles_post_ra>
